<compile_context>
chip_gen: v5e
topology: v5e:2x2
jax: 0.10.0
libtpu: 0.0.40
codegen_flags: <defaults>
</compile_context>

<pallas_src>
import math

import jax
import jax.numpy as jnp
from jax.experimental import pallas as pl
from jax.experimental.pallas import tpu as pltpu


# ---------------------------------------------------------------------------
# Sinusoidal table (mirrors the PyTorch __init__), built once in model dtype.
# ---------------------------------------------------------------------------
def make_positional_encoding(d_model: int, max_len: int = 5000,
                             dtype=jnp.float32) -> jnp.ndarray:
    position = jnp.arange(0, max_len, dtype=jnp.float32)[:, None]        # (max_len, 1)
    div_term = jnp.exp(
        jnp.arange(0, d_model, 2, dtype=jnp.float32) * (-math.log(10000.0) / d_model)
    )                                                                     # (ceil(d/2),)
    angles = position * div_term                                          # (max_len, ceil(d/2))
    pe = jnp.zeros((max_len, d_model), dtype=jnp.float32)
    pe = pe.at[:, 0::2].set(jnp.sin(angles))
    pe = pe.at[:, 1::2].set(jnp.cos(angles)[:, : d_model // 2])           # safe for odd d_model
    return pe.astype(dtype)


# ---------------------------------------------------------------------------
# Kernel: pure VPU elementwise add with broadcast over the leading batch dim.
#   path A: x_ref (B, TR, D) + pe_ref (TR, D)
#   path B: x_ref (B, TL)    + pe_ref (1, TL)
# ---------------------------------------------------------------------------
def _pe_add_kernel(x_ref, pe_ref, o_ref):
    o_ref[...] = x_ref[...] + pe_ref[...]


# ---------------------------------------------------------------------------
# Tile sizing (generation-safe byte budgets, dtype-aware sublane quantum).
# ---------------------------------------------------------------------------
_VMEM_BUFFER_BUDGET = 16 * 1024 * 1024   # double-buffered in + out + pe (padded)
_VMEM_LIMIT_BYTES = 32 * 1024 * 1024     # explicit; < physical on v5e/v6e/v7x


def _sublane_quantum(itemsize: int) -> int:
    # f32 -> 8, bf16 -> 16, int8/fp8 -> 32 (sub-32-bit packs along sublanes)
    return max(8, 32 // max(1, itemsize))


def _round_down(n: int, m: int) -> int:
    return (n // m) * m


def _pick_row_tile(B: int, S: int, D: int, itemsize: int) -> int:
    """TR for blocks (B, TR, D) / (TR, D); D is a multiple of 128 here."""
    q = _sublane_quantum(itemsize)
    per_tr = 2 * (2 * B + 1) * D * itemsize          # x in + x out + pe, double-buffered
    tr = _VMEM_BUFFER_BUDGET // max(1, per_tr)
    tr = max(q, _round_down(tr, q))
    if S < q:
        return S                                      # full seq dim: always a legal block
    return min(tr, _round_down(S, q))                 # cdiv grid handles the remainder


def _pick_flat_tile(B: int, SD: int, itemsize: int) -> int:
    """TL for blocks (B, TL) / (1, TL) over the flattened S*D axis."""
    q = _sublane_quantum(itemsize)
    pad_b = -(-B // q) * q                            # sublane-padded batch rows in VMEM
    per_tl = 2 * (2 * pad_b + q) * itemsize           # padded x in/out + padded pe, x2 buffers
    tl = _VMEM_BUFFER_BUDGET // max(1, per_tl)
    tl = max(128, _round_down(tl, 128))
    if SD < 128:
        return SD                                     # full flat dim: legal block, tiny tensor
    return min(tl, _round_down(SD, 128))              # cdiv grid handles the remainder


# ---------------------------------------------------------------------------
# Forward: x (B, S, D) + pe[:S] broadcast over batch.
# ---------------------------------------------------------------------------
def positional_encoding_forward(x: jnp.ndarray, pe: jnp.ndarray) -> jnp.ndarray:
    B, S, D = x.shape
    max_len = pe.shape[0]
    assert S <= max_len, "sequence longer than positional-encoding table"
    if pe.dtype != x.dtype:
        # Only hit if the caller did not build the table in the model dtype.
        pe = pe.astype(x.dtype)
    itemsize = jnp.dtype(x.dtype).itemsize

    params = pltpu.CompilerParams(
        dimension_semantics=("parallel",),
        vmem_limit_bytes=_VMEM_LIMIT_BYTES,
    )

    if D % 128 == 0:
        # Path A: D already lane-dense; row tiles with batch folded into the block.
        TR = _pick_row_tile(B, S, D, itemsize)
        return pl.pallas_call(
            _pe_add_kernel,
            out_shape=jax.ShapeDtypeStruct((B, S, D), x.dtype),
            grid=(pl.cdiv(S, TR),),
            in_specs=[
                pl.BlockSpec((B, TR, D), lambda t: (0, t, 0)),   # x row tile (all batches)
                pl.BlockSpec((TR, D), lambda t: (t, 0)),         # matching rows of full table
            ],
            out_specs=pl.BlockSpec((B, TR, D), lambda t: (0, t, 0)),
            compiler_params=params,
        )(x, pe)

    # Path B: D not a multiple of 128 -> flatten (S, D) -> S*D so the last
    # (lane) dim of every block is a large multiple of 128 (unmasked stores).
    SD = S * D
    x_flat = x.reshape(B, SD)                         # free contiguous reshape
    pe_flat = pe.reshape(1, max_len * D)              # free; no per-call slice of the table
    TL = _pick_flat_tile(B, SD, itemsize)
    out_flat = pl.pallas_call(
        _pe_add_kernel,
        out_shape=jax.ShapeDtypeStruct((B, SD), x.dtype),
        grid=(pl.cdiv(SD, TL),),
        in_specs=[
            pl.BlockSpec((B, TL), lambda t: (0, t)),             # x flat tile (all batches)
            pl.BlockSpec((1, TL), lambda t: (0, t)),             # matching flat pe tile
        ],
        out_specs=pl.BlockSpec((B, TL), lambda t: (0, t)),
        compiler_params=params,
    )(x_flat, pe_flat)
    return out_flat.reshape(B, S, D)


if __name__ == "__main__":
    key = jax.random.PRNGKey(0)

    # --- main demo: small shapes, D not a multiple of 128 (flat path) -------
    B, S, D = 2, 8, 32
    MAX_LEN = 64  # small table for the example; semantics identical to 5000
    x = jax.random.normal(key, (B, S, D), dtype=jnp.float32)
    pe = make_positional_encoding(D, MAX_LEN, dtype=x.dtype)   # built once, model dtype

    out = positional_encoding_forward(x, pe)
    out = jax.block_until_ready(out)

    ref = x + pe[None, :S, :]
    assert out.shape == (B, S, D)
    assert jnp.allclose(out, ref, atol=1e-6), "mismatch vs reference (flat path)"

    # --- secondary check: lane-dense D (row-tile path) ----------------------
    B2, S2, D2 = 2, 16, 128
    x2 = jax.random.normal(jax.random.PRNGKey(1), (B2, S2, D2), dtype=jnp.float32)
    pe2 = make_positional_encoding(D2, MAX_LEN, dtype=x2.dtype)
    out2 = jax.block_until_ready(positional_encoding_forward(x2, pe2))
    ref2 = x2 + pe2[None, :S2, :]
    assert jnp.allclose(out2, ref2, atol=1e-6), "mismatch vs reference (row path)"

    print("KERNEL_OK")
</pallas_src>

<mosaic_0001>
module attributes {stable_mosaic.version = 11 : i64} {
  func.func @_pe_add_kernel(%arg0: i32, %arg1: memref<2x256xf32, #tpu.memory_space<vmem>>, %arg2: memref<1x256xf32, #tpu.memory_space<vmem>>, %arg3: memref<2x256xf32, #tpu.memory_space<vmem>>) attributes {dimension_semantics = [#tpu.dimension_semantics<parallel>], iteration_bounds = array<i64: 1>, scalar_prefetch = 0 : i64, scratch_operands = 0 : i64, tpu.core_type = #tpu.core_type<tc>, window_params = [{transform_indices = @transform_0, window_bounds = array<i64: 2, 256>}, {transform_indices = @transform_1, window_bounds = array<i64: 1, 256>}, {transform_indices = @transform_2, window_bounds = array<i64: 2, 256>}]} {
    %c0 = arith.constant 0 : index
    %c0_0 = arith.constant 0 : index
    %0 = vector.load %arg1[%c0, %c0_0] : memref<2x256xf32, #tpu.memory_space<vmem>>, vector<2x256xf32>
    %c0_1 = arith.constant 0 : index
    %c0_2 = arith.constant 0 : index
    %1 = vector.load %arg2[%c0_1, %c0_2] : memref<1x256xf32, #tpu.memory_space<vmem>>, vector<1x256xf32>
    %2 = vector.broadcast %1 : vector<1x256xf32> to vector<2x256xf32>
    %3 = arith.addf %0, %2 : vector<2x256xf32>
    %c0_3 = arith.constant 0 : index
    %c0_4 = arith.constant 0 : index
    %4 = vector.load %arg3[%c0_3, %c0_4] : memref<2x256xf32, #tpu.memory_space<vmem>>, vector<2x256xf32>
    tpu.vector_store %arg3[%c0_3, %c0_4], %3 {strides = array<i32>} : memref<2x256xf32, #tpu.memory_space<vmem>>, vector<2x256xf32>,
    return
  }
  func.func @transform_0(%arg0: i32) -> (i32, i32) {
    %c0_i32 = arith.constant 0 : i32
    %c0_i32_0 = arith.constant 0 : i32
    return %c0_i32, %arg0 : i32, i32
  }
  func.func @transform_1(%arg0: i32) -> (i32, i32) {
    %c0_i32 = arith.constant 0 : i32
    %c0_i32_0 = arith.constant 0 : i32
    return %c0_i32, %arg0 : i32, i32
  }
  func.func @transform_2(%arg0: i32) -> (i32, i32) {
    %c0_i32 = arith.constant 0 : i32
    %c0_i32_0 = arith.constant 0 : i32
    return %c0_i32, %arg0 : i32, i32
  }
}

</mosaic_0001>

<bundles_post_ra>
// kernel: tpu_custom_call.1
= control target key start
LH: loop header
LB: loop body
LE: loop exit
PB: predicated region body
PF: predicated region fallthrough
CT: control target
= control target key end

     0   :  { %7 = vsyncpa [#allocation3], 0  ;;  %s177_s0 = inlined_call_operand.hbm [shape: f32[2,256], index: 0, kind: input, shape index: {}]   ;;  %s178_s1 = inlined_call_operand.hbm [shape: f32[1,2048], index: 1, kind: input, shape index: {}]   ;;  %s179_s2 = inlined_call_operand.hbm [shape: f32[2,256], index: 2, kind: output, shape index: {}]  }
   0x1   :  { %8 = vsyncpa [#allocation6], 0 }
   0x2   :  { %9 = vsyncpa [#allocation4], 0  ;;  %s15_s11 = sshll.u32 %s177_s0, 4  ;;  %s150_s12 = smov [#allocation2]   ;;  %s16_s11 = int_to_ptr.hbm [resolvable:$true] %s15_s11 }
   0x3   :  { %s17_s13 = sshll.u32 %s150_s12, 4  ;;  %s26_s16 = sshll.u32 %s178_s1, 4  ;;  %s18_s13 = int_to_ptr.vmem [resolvable:$true] %s17_s13  ;;  %s27_s16 = int_to_ptr.hbm [resolvable:$true] %s26_s16 }
   0x4   :  { %20 = dma.hbm_to_vmem [thread:$0]  %s16_s11, 64, %s18_s13, [#allocation3]  }
   0x5   :  { %s151_s17 = smov [#allocation5]  }
   0x6   :  { %s28_s18 = sshll.u32 %s151_s17, 4  ;;  %s29_s18 = int_to_ptr.vmem [resolvable:$true] %s28_s18 }
   0x7   :  { %31 = dma.hbm_to_vmem [thread:$0]  %s27_s16, 32, %s29_s18, [#allocation6]  }
   0x8   :  { %144 = dma.done.wait [#allocation3], 64  }
   0x9   :  { %145 = vsyncadd [#allocation3], 4294967232 }
   0xa   :  { %146 = dma.done.wait [#allocation6], 32  }
   0xb   :  { %147 = vsyncadd [#allocation6], 4294967264  ;;  %v41_v0 = vld [vmem:[#allocation5] sm:$0x3]  ;;  %vm46_vm0 = vcmask 1041408   ;;  %s152_s0 = smov [#allocation7]  }
   0xc   :  { %v43_v1 = vperm.slane %v41_v0, 0  ;;  %v44_v2 = vperm.slane %v41_v0, 1  ;;  %v40_v3 = vld [vmem:[#allocation2] sm:$0xf]  ;;  %s56_s19 = sshll.u32 %s152_s0, 4  ;;  %s58_s21 = sshll.u32 %s179_s2, 4  ;;  %s57_s19 = int_to_ptr.vmem [resolvable:$true] %s56_s19  ;;  %s59_s21 = int_to_ptr.hbm [resolvable:$true] %s58_s21 }
   0xe   :  { %v45_v4 = vrot.slane %v44_v2, 6 }
  0x10   :  { %v47_v5 = vsel %vm46_vm0, %v43_v1, %v45_v4 }
  0x11   :  { %v49_v6 = vadd.f32 %v47_v5, %v40_v3 }
  0x13   :  { %50 = vst [vmem:[#allocation7] sm:$0xf] %v49_v6 }
  0x14   :  { %61 = dma.vmem_to_hbm [thread:$0]  %s57_s19, 64, %s59_s21, [#allocation4]  }
  0x15   :  { %148 = dma.done.wait [#allocation4], 64  }
  0x16   :  { %149 = vsyncadd [#allocation4], 4294967232 }
  0x17   :  { %66 = vsyncpa [#allocation3], 1 }
  0x18   :  { %67 = vsyncpa [#allocation6], 1 }
  0x19   :  { %68 = vsyncpa [#allocation4], 1 }

</bundles_post_ra>
